<compile_context>
chip_gen: v7x
topology: tpu7x:2x2x1
jax: 0.10.0
libtpu: 0.0.40
codegen_flags: <defaults>
</compile_context>

<pallas_src>
import math

import jax
import jax.numpy as jnp
from jax.experimental import pallas as pl
from jax.experimental.pallas import tpu as pltpu

_MIB = 1024 * 1024


# ---------------------------------------------------------------------------
# Pallas kernel: 3 fused GraphConvolution layers + leaky_relu(0.2)
# ---------------------------------------------------------------------------
def _gcn_kernel(y_ref, s_ref, w1_ref, w2_ref, w3_ref, o_ref):
    bt, n, _ = y_ref.shape
    bf16 = jnp.bfloat16
    f32 = jnp.float32

    s = s_ref[...]                       # (n, n) bf16, loaded once

    def leaky(h):                        # leaky_relu(., 0.2) == max(h, 0.2h)
        return jnp.maximum(h, 0.2 * h)

    def s_matmul(x):                     # bf16 (bt, n, f) -> fp32 (bt, n, f)
        # Per-batch 2-D dots (statically unrolled): no broadcast of S, no
        # bt copies of S in VMEM / vregs.
        return jnp.stack(
            [jnp.dot(s, x[b], preferred_element_type=f32) for b in range(bt)],
            axis=0)

    def w_matmul(x, w_ref):              # bf16 (bt, n, f) x (f, g) -> fp32
        f = x.shape[-1]
        g = w_ref.shape[-1]
        # Merging (bt, n) is layout-free since n is a multiple of 16.
        h = jnp.dot(x.reshape(bt * n, f), w_ref[...],
                    preferred_element_type=f32)
        return h.reshape(bt, n, g)

    y = y_ref[...]                       # (bt, n, Fin) bf16

    # layer 1:  (S @ Y) @ W1      (Fin <= hidden  -> cheaper S matmul first)
    h = s_matmul(y)
    h = leaky(w_matmul(h.astype(bf16), w1_ref))

    # layer 2:  S @ (H @ W2)
    h = w_matmul(h.astype(bf16), w2_ref)
    h = leaky(s_matmul(h.astype(bf16)))

    # layer 3:  (S @ H) @ W3      (hidden <= Fout -> cheaper S matmul first)
    h = s_matmul(h.astype(bf16))
    h = leaky(w_matmul(h.astype(bf16), w3_ref))

    o_ref[...] = h.astype(o_ref.dtype)


# ---------------------------------------------------------------------------
# Hardware / sizing helpers
# ---------------------------------------------------------------------------
def _round_up(x, m):
    return ((x + m - 1) // m) * m


def _tpu_generation_info():
    """Returns (per-core VMEM bytes, TensorCores per chip) with safe fallbacks."""
    kind = ""
    try:
        kind = jax.devices()[0].device_kind.lower()
    except Exception:
        pass
    vmem = None
    try:
        vmem = int(pltpu.get_tpu_info().vmem_capacity_bytes)
    except Exception:
        pass
    is_v7 = ("v7" in kind) or ("7x" in kind) or (
        vmem is not None and vmem <= 96 * _MIB)
    if vmem is None:
        vmem = 64 * _MIB if is_v7 else 128 * _MIB   # conservative fallback
    if is_v7:
        vmem = min(vmem, 64 * _MIB)                 # per-TC VMEM on v7x
    return vmem, (2 if is_v7 else 1)


def _vmem_bytes_estimate(bt, np_, fip, hp, fop, out_itemsize):
    # y block (bf16, double-buffered) + out block (double-buffered)
    # + single-buffered static operands (bf16) + rough fp32 live temps.
    return (2 * 2 * bt * np_ * fip
            + 2 * out_itemsize * bt * np_ * fop
            + 2 * (np_ * np_ + fip * hp + hp * hp + hp * fop)
            + 4 * bt * np_ * (fip + 2 * max(hp, fop)))


def _pick_bt(batch, np_, fip, hp, fop, out_itemsize, *, vmem_budget, n_tc):
    def fits(bt):
        return _vmem_bytes_estimate(bt, np_, fip, hp, fop,
                                    out_itemsize) <= vmem_budget

    divisors = [d for d in range(1, batch + 1) if batch % d == 0]
    fitting = [d for d in divisors if fits(d)] or [1]

    if n_tc <= 1 or batch < 2:
        # Single TensorCore: grid is a sequential loop -> fewest, fattest steps.
        return max(fitting)

    # v7x (2 TCs): keep >= 2 (preferably an even number of) grid steps so the
    # 'parallel' batch axis load-balances, while still feeding the 256-deep MXU.
    multi = [d for d in fitting if batch // d >= 2]
    pool = [d for d in multi if (batch // d) % 2 == 0] or multi or fitting
    big = [d for d in pool if d * np_ >= 256]
    return min(big) if big else max(pool)


# ---------------------------------------------------------------------------
# Init-time preparation of the grid-invariant operands (padded ONCE)
# ---------------------------------------------------------------------------
def prepare_gcn_params(special_matrix, w1, w2, w3):
    N = special_matrix.shape[0]
    Fin, hidden = w1.shape
    Fout = w3.shape[1]
    assert w2.shape == (hidden, hidden)
    assert w3.shape == (hidden, Fout)

    Np = _round_up(N, 16)        # bf16 packs 16 sublanes per vreg
    Fip = _round_up(Fin, 128)    # lane-dense features
    Hp = _round_up(hidden, 128)
    Fop = _round_up(Fout, 128)

    bf16 = jnp.bfloat16
    # Zero padding is inert: padded S rows/cols, node rows and feature
    # rows/cols are all zero, and leaky_relu(0) == 0.
    s_p = jnp.zeros((Np, Np), bf16).at[:N, :N].set(special_matrix.astype(bf16))
    w1_p = jnp.zeros((Fip, Hp), bf16).at[:Fin, :hidden].set(w1.astype(bf16))
    w2_p = jnp.zeros((Hp, Hp), bf16).at[:hidden, :hidden].set(w2.astype(bf16))
    w3_p = jnp.zeros((Hp, Fop), bf16).at[:hidden, :Fout].set(w3.astype(bf16))

    dims = dict(N=N, Fin=Fin, hidden=hidden, Fout=Fout,
                Np=Np, Fip=Fip, Hp=Hp, Fop=Fop)
    return (s_p, w1_p, w2_p, w3_p), dims


# ---------------------------------------------------------------------------
# Forward wrapper: per-call activation padding + pallas_call plumbing
# ---------------------------------------------------------------------------
def gcn_encoder_forward(y, params, dims, *, bt=None, out_dtype=jnp.float32):
    """y: (B, N, Fin) fp32 -> (B, N, Fout) out_dtype."""
    s_p, w1_p, w2_p, w3_p = params
    N, Fin, Fout = dims["N"], dims["Fin"], dims["Fout"]
    Np, Fip, Hp, Fop = dims["Np"], dims["Fip"], dims["Hp"], dims["Fop"]
    B = y.shape[0]
    assert y.shape == (B, N, Fin)

    vmem_cap, n_tc = _tpu_generation_info()
    # Leave headroom for Mosaic-internal scratch: ~85% of physical per-core VMEM.
    vmem_limit = int(0.85 * vmem_cap)

    out_itemsize = jnp.dtype(out_dtype).itemsize
    if bt is None:
        bt = _pick_bt(B, Np, Fip, Hp, Fop, out_itemsize,
                      vmem_budget=int(0.75 * vmem_limit), n_tc=n_tc)
    assert B % bt == 0, (B, bt)
    grid = (B // bt,)

    bf16 = jnp.bfloat16
    # Per-call padding of the activations only (statics were padded at init).
    # TODO(synk): fold this pad into upstream preprocessing so y is not
    # rewritten to HBM before the kernel.
    y_p = jnp.zeros((B, Np, Fip), bf16).at[:, :N, :Fin].set(y.astype(bf16))

    # Advisory cost estimate (padded dims = actual MXU work).
    flops = int(2 * B * (Np * Np * Fip + Np * Fip * Hp          # layer 1
                         + Np * Hp * Hp + Np * Np * Hp          # layer 2
                         + Np * Np * Hp + Np * Hp * Fop))       # layer 3
    bytes_accessed = int(
        y_p.size * 2 + s_p.size * 2
        + (w1_p.size + w2_p.size + w3_p.size) * 2
        + B * Np * Fop * out_itemsize)

    def build(single_buffer):
        if single_buffer:
            # Grid-invariant blocks: single-buffer them (constant index_map,
            # so double-buffering would just burn VMEM).
            def static_spec(shape):
                return pl.BlockSpec(shape, lambda b: (0, 0),
                                    pipeline_mode=pl.Buffered(1))
        else:
            def static_spec(shape):
                return pl.BlockSpec(shape, lambda b: (0, 0))

        return pl.pallas_call(
            _gcn_kernel,
            out_shape=jax.ShapeDtypeStruct((B, Np, Fop), out_dtype),
            grid_spec=pltpu.PrefetchScalarGridSpec(
                num_scalar_prefetch=0,
                grid=grid,
                in_specs=[
                    pl.BlockSpec((bt, Np, Fip), lambda b: (b, 0, 0)),
                    static_spec((Np, Np)),
                    static_spec((Fip, Hp)),
                    static_spec((Hp, Hp)),
                    static_spec((Hp, Fop)),
                ],
                out_specs=pl.BlockSpec((bt, Np, Fop), lambda b: (b, 0, 0)),
            ),
            compiler_params=pltpu.CompilerParams(
                dimension_semantics=("parallel",),
                vmem_limit_bytes=vmem_limit),
            cost_estimate=pl.CostEstimate(
                flops=flops, transcendentals=0,
                bytes_accessed=bytes_accessed),
        )

    try:
        out = build(single_buffer=True)(y_p, s_p, w1_p, w2_p, w3_p)
    except Exception:
        # Older Pallas without BlockSpec(pipeline_mode=...): fall back to the
        # default (double-buffered) specs so the kernel still runs.
        out = build(single_buffer=False)(y_p, s_p, w1_p, w2_p, w3_p)

    return out[:, :N, :Fout]


# ---------------------------------------------------------------------------
# Plain-JAX glue: parameter init + adjacency normalization (preprocessing)
# ---------------------------------------------------------------------------
def xavier_uniform(key, fan_in, fan_out):
    bound = math.sqrt(6.0 / (fan_in + fan_out))
    return jax.random.uniform(key, (fan_in, fan_out), jnp.float32,
                              minval=-bound, maxval=bound)


def build_special_matrix(adj_matrix):
    # Mirrors GCN.__init__ exactly:
    #   adj += I
    #   degree = sum(adj != 0, axis=1)          (binary count, as in torch)
    #   Dinv = diag(degree ** -0.5)
    #   S = (adj @ Dinv).T @ Dinv
    n = adj_matrix.shape[0]
    adj = adj_matrix + jnp.eye(n, dtype=adj_matrix.dtype)
    degree = jnp.sum((adj != 0.0).astype(jnp.float32), axis=1)
    inv_deg_sqrt = jnp.diag(jnp.power(degree, -0.5))
    special = (adj @ inv_deg_sqrt).T @ inv_deg_sqrt
    return special.astype(jnp.float32)


def reference_forward(y, s, w1, w2, w3):
    def leaky(h):
        return jnp.where(h >= 0.0, h, 0.2 * h)
    h = leaky(jnp.einsum("nm,bmf->bnf", s, y @ w1))
    h = leaky(jnp.einsum("nm,bmf->bnf", s, h @ w2))
    h = leaky(jnp.einsum("nm,bmf->bnf", s, h @ w3))
    return h


if __name__ == "__main__":
    # Small shapes consistent with the module (defaults 51/160/320 scaled down).
    B, N = 2, 8
    in_features, hidden_features, out_features = 16, 32, 64

    key = jax.random.PRNGKey(0)
    k_adj, k_y, k_w1, k_w2, k_w3 = jax.random.split(key, 5)

    # Deterministic synthetic symmetric 0/1 adjacency (stands in for the .npz).
    a = (jax.random.uniform(k_adj, (N, N)) > 0.5).astype(jnp.float32)
    adj_matrix = jnp.maximum(a, a.T)
    adj_matrix = adj_matrix * (1.0 - jnp.eye(N))  # no self loops; GCN adds I

    special_matrix = build_special_matrix(adj_matrix)

    # Xavier-uniform weights, exactly the shapes GraphConvolution declares.
    w1 = xavier_uniform(k_w1, in_features, hidden_features)
    w2 = xavier_uniform(k_w2, hidden_features, hidden_features)
    w3 = xavier_uniform(k_w3, hidden_features, out_features)

    y = jax.random.normal(k_y, (B, N, in_features), jnp.float32)

    params, dims = prepare_gcn_params(special_matrix, w1, w2, w3)  # init-time
    out = gcn_encoder_forward(y, params, dims)
    out = jax.block_until_ready(out)

    ref = reference_forward(y, special_matrix, w1, w2, w3)
    assert out.shape == (B, N, out_features)
    # bf16 MXU compute (fp32 accumulation) vs. fp32 reference: check relative
    # max error rather than a tight absolute tolerance.
    rel_err = float(jnp.max(jnp.abs(out - ref)) /
                    (jnp.max(jnp.abs(ref)) + 1e-6))
    assert rel_err < 5e-2, rel_err

    print("KERNEL_OK")
</pallas_src>

<mosaic_0001>
module attributes {stable_mosaic.version = 11 : i64} {
  func.func @_gcn_kernel(%arg0: i32, %arg1: memref<2x16x128xbf16, #tpu.memory_space<vmem>>, %arg2: memref<16x16xbf16, #tpu.memory_space<vmem>>, %arg3: memref<128x128xbf16, #tpu.memory_space<vmem>>, %arg4: memref<128x128xbf16, #tpu.memory_space<vmem>>, %arg5: memref<128x128xbf16, #tpu.memory_space<vmem>>, %arg6: memref<2x16x128xf32, #tpu.memory_space<vmem>>) attributes {dimension_semantics = [#tpu.dimension_semantics<parallel>], iteration_bounds = array<i64: 1>, scalar_prefetch = 0 : i64, scratch_operands = 0 : i64, tpu.core_type = #tpu.core_type<tc>, window_params = [{transform_indices = @transform_0, window_bounds = array<i64: 2, 16, 128>}, {pipeline_mode = #tpu.pipeline_mode<synchronous>, transform_indices = @transform_1, window_bounds = array<i64: 16, 16>}, {pipeline_mode = #tpu.pipeline_mode<synchronous>, transform_indices = @transform_2, window_bounds = array<i64: 128, 128>}, {pipeline_mode = #tpu.pipeline_mode<synchronous>, transform_indices = @transform_3, window_bounds = array<i64: 128, 128>}, {pipeline_mode = #tpu.pipeline_mode<synchronous>, transform_indices = @transform_4, window_bounds = array<i64: 128, 128>}, {transform_indices = @transform_5, window_bounds = array<i64: 2, 16, 128>}]} {
    %c0 = arith.constant 0 : index
    %c0_0 = arith.constant 0 : index
    %0 = vector.load %arg2[%c0, %c0_0] : memref<16x16xbf16, #tpu.memory_space<vmem>>, vector<16x16xbf16>
    %c0_1 = arith.constant 0 : index
    %c0_2 = arith.constant 0 : index
    %c0_3 = arith.constant 0 : index
    %1 = vector.load %arg1[%c0_1, %c0_2, %c0_3] : memref<2x16x128xbf16, #tpu.memory_space<vmem>>, vector<2x16x128xbf16>
    %2 = vector.extract_strided_slice %1 {offsets = [0, 0, 0], sizes = [1, 16, 128], strides = [1, 1, 1]} : vector<2x16x128xbf16> to vector<1x16x128xbf16>
    %3 = vector.shape_cast %2 : vector<1x16x128xbf16> to vector<16x128xbf16>
    %cst = arith.constant dense<0.000000e+00> : vector<16x128xf32>
    %4 = tpu.matmul %0, %3, %cst {dimension_numbers = #tpu.dot_dimension_numbers<[1], [0], [0], [1], [0, 0, 1, 1], [], []>} : vector<16x16xbf16>, vector<16x128xbf16>, vector<16x128xf32> -> vector<16x128xf32>
    %5 = vector.extract_strided_slice %1 {offsets = [1, 0, 0], sizes = [1, 16, 128], strides = [1, 1, 1]} : vector<2x16x128xbf16> to vector<1x16x128xbf16>
    %6 = vector.shape_cast %5 : vector<1x16x128xbf16> to vector<16x128xbf16>
    %cst_4 = arith.constant dense<0.000000e+00> : vector<16x128xf32>
    %7 = tpu.matmul %0, %6, %cst_4 {dimension_numbers = #tpu.dot_dimension_numbers<[1], [0], [0], [1], [0, 0, 1, 1], [], []>} : vector<16x16xbf16>, vector<16x128xbf16>, vector<16x128xf32> -> vector<16x128xf32>
    %8 = vector.shape_cast %4 : vector<16x128xf32> to vector<1x16x128xf32>
    %9 = vector.shape_cast %7 : vector<16x128xf32> to vector<1x16x128xf32>
    %10 = tpu.concatenate %8, %9 in 0 : vector<1x16x128xf32>, vector<1x16x128xf32> -> vector<2x16x128xf32>
    %11 = arith.truncf %10 : vector<2x16x128xf32> to vector<2x16x128xbf16>
    %12 = vector.shape_cast %11 : vector<2x16x128xbf16> to vector<32x128xbf16>
    %c0_5 = arith.constant 0 : index
    %c0_6 = arith.constant 0 : index
    %13 = vector.load %arg3[%c0_5, %c0_6] : memref<128x128xbf16, #tpu.memory_space<vmem>>, vector<128x128xbf16>
    %cst_7 = arith.constant dense<0.000000e+00> : vector<32x128xf32>
    %14 = tpu.matmul %12, %13, %cst_7 {dimension_numbers = #tpu.dot_dimension_numbers<[1], [0], [0], [1], [0, 0, 1, 1], [], []>} : vector<32x128xbf16>, vector<128x128xbf16>, vector<32x128xf32> -> vector<32x128xf32>
    %15 = vector.shape_cast %14 : vector<32x128xf32> to vector<2x16x128xf32>
    %cst_8 = arith.constant 2.000000e-01 : f32
    %16 = vector.broadcast %cst_8 : f32 to vector<2x16x128xf32>
    %17 = arith.mulf %16, %15 : vector<2x16x128xf32>
    %18 = arith.maximumf %15, %17 : vector<2x16x128xf32>
    %19 = arith.truncf %18 : vector<2x16x128xf32> to vector<2x16x128xbf16>
    %20 = vector.shape_cast %19 : vector<2x16x128xbf16> to vector<32x128xbf16>
    %c0_9 = arith.constant 0 : index
    %c0_10 = arith.constant 0 : index
    %21 = vector.load %arg4[%c0_9, %c0_10] : memref<128x128xbf16, #tpu.memory_space<vmem>>, vector<128x128xbf16>
    %cst_11 = arith.constant dense<0.000000e+00> : vector<32x128xf32>
    %22 = tpu.matmul %20, %21, %cst_11 {dimension_numbers = #tpu.dot_dimension_numbers<[1], [0], [0], [1], [0, 0, 1, 1], [], []>} : vector<32x128xbf16>, vector<128x128xbf16>, vector<32x128xf32> -> vector<32x128xf32>
    %23 = vector.shape_cast %22 : vector<32x128xf32> to vector<2x16x128xf32>
    %24 = arith.truncf %23 : vector<2x16x128xf32> to vector<2x16x128xbf16>
    %25 = vector.extract_strided_slice %24 {offsets = [0, 0, 0], sizes = [1, 16, 128], strides = [1, 1, 1]} : vector<2x16x128xbf16> to vector<1x16x128xbf16>
    %26 = vector.shape_cast %25 : vector<1x16x128xbf16> to vector<16x128xbf16>
    %cst_12 = arith.constant dense<0.000000e+00> : vector<16x128xf32>
    %27 = tpu.matmul %0, %26, %cst_12 {dimension_numbers = #tpu.dot_dimension_numbers<[1], [0], [0], [1], [0, 0, 1, 1], [], []>} : vector<16x16xbf16>, vector<16x128xbf16>, vector<16x128xf32> -> vector<16x128xf32>
    %28 = vector.extract_strided_slice %24 {offsets = [1, 0, 0], sizes = [1, 16, 128], strides = [1, 1, 1]} : vector<2x16x128xbf16> to vector<1x16x128xbf16>
    %29 = vector.shape_cast %28 : vector<1x16x128xbf16> to vector<16x128xbf16>
    %cst_13 = arith.constant dense<0.000000e+00> : vector<16x128xf32>
    %30 = tpu.matmul %0, %29, %cst_13 {dimension_numbers = #tpu.dot_dimension_numbers<[1], [0], [0], [1], [0, 0, 1, 1], [], []>} : vector<16x16xbf16>, vector<16x128xbf16>, vector<16x128xf32> -> vector<16x128xf32>
    %31 = vector.shape_cast %27 : vector<16x128xf32> to vector<1x16x128xf32>
    %32 = vector.shape_cast %30 : vector<16x128xf32> to vector<1x16x128xf32>
    %33 = tpu.concatenate %31, %32 in 0 : vector<1x16x128xf32>, vector<1x16x128xf32> -> vector<2x16x128xf32>
    %cst_14 = arith.constant 2.000000e-01 : f32
    %34 = vector.broadcast %cst_14 : f32 to vector<2x16x128xf32>
    %35 = arith.mulf %34, %33 : vector<2x16x128xf32>
    %36 = arith.maximumf %33, %35 : vector<2x16x128xf32>
    %37 = arith.truncf %36 : vector<2x16x128xf32> to vector<2x16x128xbf16>
    %38 = vector.extract_strided_slice %37 {offsets = [0, 0, 0], sizes = [1, 16, 128], strides = [1, 1, 1]} : vector<2x16x128xbf16> to vector<1x16x128xbf16>
    %39 = vector.shape_cast %38 : vector<1x16x128xbf16> to vector<16x128xbf16>
    %cst_15 = arith.constant dense<0.000000e+00> : vector<16x128xf32>
    %40 = tpu.matmul %0, %39, %cst_15 {dimension_numbers = #tpu.dot_dimension_numbers<[1], [0], [0], [1], [0, 0, 1, 1], [], []>} : vector<16x16xbf16>, vector<16x128xbf16>, vector<16x128xf32> -> vector<16x128xf32>
    %41 = vector.extract_strided_slice %37 {offsets = [1, 0, 0], sizes = [1, 16, 128], strides = [1, 1, 1]} : vector<2x16x128xbf16> to vector<1x16x128xbf16>
    %42 = vector.shape_cast %41 : vector<1x16x128xbf16> to vector<16x128xbf16>
    %cst_16 = arith.constant dense<0.000000e+00> : vector<16x128xf32>
    %43 = tpu.matmul %0, %42, %cst_16 {dimension_numbers = #tpu.dot_dimension_numbers<[1], [0], [0], [1], [0, 0, 1, 1], [], []>} : vector<16x16xbf16>, vector<16x128xbf16>, vector<16x128xf32> -> vector<16x128xf32>
    %44 = vector.shape_cast %40 : vector<16x128xf32> to vector<1x16x128xf32>
    %45 = vector.shape_cast %43 : vector<16x128xf32> to vector<1x16x128xf32>
    %46 = tpu.concatenate %44, %45 in 0 : vector<1x16x128xf32>, vector<1x16x128xf32> -> vector<2x16x128xf32>
    %47 = arith.truncf %46 : vector<2x16x128xf32> to vector<2x16x128xbf16>
    %48 = vector.shape_cast %47 : vector<2x16x128xbf16> to vector<32x128xbf16>
    %c0_17 = arith.constant 0 : index
    %c0_18 = arith.constant 0 : index
    %49 = vector.load %arg5[%c0_17, %c0_18] : memref<128x128xbf16, #tpu.memory_space<vmem>>, vector<128x128xbf16>
    %cst_19 = arith.constant dense<0.000000e+00> : vector<32x128xf32>
    %50 = tpu.matmul %48, %49, %cst_19 {dimension_numbers = #tpu.dot_dimension_numbers<[1], [0], [0], [1], [0, 0, 1, 1], [], []>} : vector<32x128xbf16>, vector<128x128xbf16>, vector<32x128xf32> -> vector<32x128xf32>
    %51 = vector.shape_cast %50 : vector<32x128xf32> to vector<2x16x128xf32>
    %cst_20 = arith.constant 2.000000e-01 : f32
    %52 = vector.broadcast %cst_20 : f32 to vector<2x16x128xf32>
    %53 = arith.mulf %52, %51 : vector<2x16x128xf32>
    %54 = arith.maximumf %51, %53 : vector<2x16x128xf32>
    %c0_21 = arith.constant 0 : index
    %c0_22 = arith.constant 0 : index
    %c0_23 = arith.constant 0 : index
    %55 = vector.load %arg6[%c0_21, %c0_22, %c0_23] : memref<2x16x128xf32, #tpu.memory_space<vmem>>, vector<2x16x128xf32>
    tpu.vector_store %arg6[%c0_21, %c0_22, %c0_23], %54 {strides = array<i32>} : memref<2x16x128xf32, #tpu.memory_space<vmem>>, vector<2x16x128xf32>,
    return
  }
  func.func @transform_0(%arg0: i32) -> (i32, i32, i32) {
    %c0_i32 = arith.constant 0 : i32
    %c0_i32_0 = arith.constant 0 : i32
    %c0_i32_1 = arith.constant 0 : i32
    return %arg0, %c0_i32, %c0_i32_0 : i32, i32, i32
  }
  func.func @transform_1(%arg0: i32) -> (i32, i32) {
    %c0_i32 = arith.constant 0 : i32
    %c0_i32_0 = arith.constant 0 : i32
    %c0_i32_1 = arith.constant 0 : i32
    return %c0_i32, %c0_i32_0 : i32, i32
  }
  func.func @transform_2(%arg0: i32) -> (i32, i32) {
    %c0_i32 = arith.constant 0 : i32
    %c0_i32_0 = arith.constant 0 : i32
    %c0_i32_1 = arith.constant 0 : i32
    return %c0_i32, %c0_i32_0 : i32, i32
  }
  func.func @transform_3(%arg0: i32) -> (i32, i32) {
    %c0_i32 = arith.constant 0 : i32
    %c0_i32_0 = arith.constant 0 : i32
    %c0_i32_1 = arith.constant 0 : i32
    return %c0_i32, %c0_i32_0 : i32, i32
  }
  func.func @transform_4(%arg0: i32) -> (i32, i32) {
    %c0_i32 = arith.constant 0 : i32
    %c0_i32_0 = arith.constant 0 : i32
    %c0_i32_1 = arith.constant 0 : i32
    return %c0_i32, %c0_i32_0 : i32, i32
  }
  func.func @transform_5(%arg0: i32) -> (i32, i32, i32) {
    %c0_i32 = arith.constant 0 : i32
    %c0_i32_0 = arith.constant 0 : i32
    %c0_i32_1 = arith.constant 0 : i32
    return %arg0, %c0_i32, %c0_i32_0 : i32, i32, i32
  }
}

module attributes {stable_mosaic.version = 11 : i64} {
  func.func @_gcn_kernel(%arg0: i32, %arg1: memref<2x16x128xbf16, #tpu.memory_space<vmem>>, %arg2: memref<16x16xbf16, #tpu.memory_space<vmem>>, %arg3: memref<128x128xbf16, #tpu.memory_space<vmem>>, %arg4: memref<128x128xbf16, #tpu.memory_space<vmem>>, %arg5: memref<128x128xbf16, #tpu.memory_space<vmem>>, %arg6: memref<2x16x128xf32, #tpu.memory_space<vmem>>) attributes {dimension_semantics = [#tpu.dimension_semantics<parallel>], iteration_bounds = array<i64: 1>, scalar_prefetch = 0 : i64, scratch_operands = 0 : i64, tpu.core_type = #tpu.core_type<tc>, window_params = [{transform_indices = @transform_0, window_bounds = array<i64: 2, 16, 128>}, {pipeline_mode = #tpu.pipeline_mode<synchronous>, transform_indices = @transform_1, window_bounds = array<i64: 16, 16>}, {pipeline_mode = #tpu.pipeline_mode<synchronous>, transform_indices = @transform_2, window_bounds = array<i64: 128, 128>}, {pipeline_mode = #tpu.pipeline_mode<synchronous>, transform_indices = @transform_3, window_bounds = array<i64: 128, 128>}, {pipeline_mode = #tpu.pipeline_mode<synchronous>, transform_indices = @transform_4, window_bounds = array<i64: 128, 128>}, {transform_indices = @transform_5, window_bounds = array<i64: 2, 16, 128>}]} {
    %c0 = arith.constant 0 : index
    %c0_0 = arith.constant 0 : index
    %0 = vector.load %arg2[%c0, %c0_0] : memref<16x16xbf16, #tpu.memory_space<vmem>>, vector<16x16xbf16>
    %c0_1 = arith.constant 0 : index
    %c0_2 = arith.constant 0 : index
    %c0_3 = arith.constant 0 : index
    %1 = vector.load %arg1[%c0_1, %c0_2, %c0_3] : memref<2x16x128xbf16, #tpu.memory_space<vmem>>, vector<2x16x128xbf16>
    %2 = vector.extract_strided_slice %1 {offsets = [0, 0, 0], sizes = [1, 16, 128], strides = [1, 1, 1]} : vector<2x16x128xbf16> to vector<1x16x128xbf16>
    %3 = vector.shape_cast %2 : vector<1x16x128xbf16> to vector<16x128xbf16>
    %cst = arith.constant dense<0.000000e+00> : vector<16x128xf32>
    %4 = tpu.matmul %0, %3, %cst {dimension_numbers = #tpu.dot_dimension_numbers<[1], [0], [0], [1], [0, 0, 1, 1], [], []>} : vector<16x16xbf16>, vector<16x128xbf16>, vector<16x128xf32> -> vector<16x128xf32>
    %5 = vector.extract_strided_slice %1 {offsets = [1, 0, 0], sizes = [1, 16, 128], strides = [1, 1, 1]} : vector<2x16x128xbf16> to vector<1x16x128xbf16>
    %6 = vector.shape_cast %5 : vector<1x16x128xbf16> to vector<16x128xbf16>
    %cst_4 = arith.constant dense<0.000000e+00> : vector<16x128xf32>
    %7 = tpu.matmul %0, %6, %cst_4 {dimension_numbers = #tpu.dot_dimension_numbers<[1], [0], [0], [1], [0, 0, 1, 1], [], []>} : vector<16x16xbf16>, vector<16x128xbf16>, vector<16x128xf32> -> vector<16x128xf32>
    %8 = vector.shape_cast %4 : vector<16x128xf32> to vector<1x16x128xf32>
    %9 = vector.shape_cast %7 : vector<16x128xf32> to vector<1x16x128xf32>
    %10 = tpu.concatenate %8, %9 in 0 : vector<1x16x128xf32>, vector<1x16x128xf32> -> vector<2x16x128xf32>
    %11 = arith.truncf %10 : vector<2x16x128xf32> to vector<2x16x128xbf16>
    %12 = vector.shape_cast %11 : vector<2x16x128xbf16> to vector<32x128xbf16>
    %c0_5 = arith.constant 0 : index
    %c0_6 = arith.constant 0 : index
    %13 = vector.load %arg3[%c0_5, %c0_6] : memref<128x128xbf16, #tpu.memory_space<vmem>>, vector<128x128xbf16>
    %cst_7 = arith.constant dense<0.000000e+00> : vector<32x128xf32>
    %14 = tpu.matmul %12, %13, %cst_7 {dimension_numbers = #tpu.dot_dimension_numbers<[1], [0], [0], [1], [0, 0, 1, 1], [], []>} : vector<32x128xbf16>, vector<128x128xbf16>, vector<32x128xf32> -> vector<32x128xf32>
    %15 = vector.shape_cast %14 : vector<32x128xf32> to vector<2x16x128xf32>
    %cst_8 = arith.constant 2.000000e-01 : f32
    %16 = vector.broadcast %cst_8 : f32 to vector<2x16x128xf32>
    %17 = arith.mulf %16, %15 : vector<2x16x128xf32>
    %18 = arith.maximumf %15, %17 : vector<2x16x128xf32>
    %19 = arith.truncf %18 : vector<2x16x128xf32> to vector<2x16x128xbf16>
    %20 = vector.shape_cast %19 : vector<2x16x128xbf16> to vector<32x128xbf16>
    %c0_9 = arith.constant 0 : index
    %c0_10 = arith.constant 0 : index
    %21 = vector.load %arg4[%c0_9, %c0_10] : memref<128x128xbf16, #tpu.memory_space<vmem>>, vector<128x128xbf16>
    %cst_11 = arith.constant dense<0.000000e+00> : vector<32x128xf32>
    %22 = tpu.matmul %20, %21, %cst_11 {dimension_numbers = #tpu.dot_dimension_numbers<[1], [0], [0], [1], [0, 0, 1, 1], [], []>} : vector<32x128xbf16>, vector<128x128xbf16>, vector<32x128xf32> -> vector<32x128xf32>
    %23 = vector.shape_cast %22 : vector<32x128xf32> to vector<2x16x128xf32>
    %24 = arith.truncf %23 : vector<2x16x128xf32> to vector<2x16x128xbf16>
    %25 = vector.extract_strided_slice %24 {offsets = [0, 0, 0], sizes = [1, 16, 128], strides = [1, 1, 1]} : vector<2x16x128xbf16> to vector<1x16x128xbf16>
    %26 = vector.shape_cast %25 : vector<1x16x128xbf16> to vector<16x128xbf16>
    %cst_12 = arith.constant dense<0.000000e+00> : vector<16x128xf32>
    %27 = tpu.matmul %0, %26, %cst_12 {dimension_numbers = #tpu.dot_dimension_numbers<[1], [0], [0], [1], [0, 0, 1, 1], [], []>} : vector<16x16xbf16>, vector<16x128xbf16>, vector<16x128xf32> -> vector<16x128xf32>
    %28 = vector.extract_strided_slice %24 {offsets = [1, 0, 0], sizes = [1, 16, 128], strides = [1, 1, 1]} : vector<2x16x128xbf16> to vector<1x16x128xbf16>
    %29 = vector.shape_cast %28 : vector<1x16x128xbf16> to vector<16x128xbf16>
    %cst_13 = arith.constant dense<0.000000e+00> : vector<16x128xf32>
    %30 = tpu.matmul %0, %29, %cst_13 {dimension_numbers = #tpu.dot_dimension_numbers<[1], [0], [0], [1], [0, 0, 1, 1], [], []>} : vector<16x16xbf16>, vector<16x128xbf16>, vector<16x128xf32> -> vector<16x128xf32>
    %31 = vector.shape_cast %27 : vector<16x128xf32> to vector<1x16x128xf32>
    %32 = vector.shape_cast %30 : vector<16x128xf32> to vector<1x16x128xf32>
    %33 = tpu.concatenate %31, %32 in 0 : vector<1x16x128xf32>, vector<1x16x128xf32> -> vector<2x16x128xf32>
    %cst_14 = arith.constant 2.000000e-01 : f32
    %34 = vector.broadcast %cst_14 : f32 to vector<2x16x128xf32>
    %35 = arith.mulf %34, %33 : vector<2x16x128xf32>
    %36 = arith.maximumf %33, %35 : vector<2x16x128xf32>
    %37 = arith.truncf %36 : vector<2x16x128xf32> to vector<2x16x128xbf16>
    %38 = vector.extract_strided_slice %37 {offsets = [0, 0, 0], sizes = [1, 16, 128], strides = [1, 1, 1]} : vector<2x16x128xbf16> to vector<1x16x128xbf16>
    %39 = vector.shape_cast %38 : vector<1x16x128xbf16> to vector<16x128xbf16>
    %cst_15 = arith.constant dense<0.000000e+00> : vector<16x128xf32>
    %40 = tpu.matmul %0, %39, %cst_15 {dimension_numbers = #tpu.dot_dimension_numbers<[1], [0], [0], [1], [0, 0, 1, 1], [], []>} : vector<16x16xbf16>, vector<16x128xbf16>, vector<16x128xf32> -> vector<16x128xf32>
    %41 = vector.extract_strided_slice %37 {offsets = [1, 0, 0], sizes = [1, 16, 128], strides = [1, 1, 1]} : vector<2x16x128xbf16> to vector<1x16x128xbf16>
    %42 = vector.shape_cast %41 : vector<1x16x128xbf16> to vector<16x128xbf16>
    %cst_16 = arith.constant dense<0.000000e+00> : vector<16x128xf32>
    %43 = tpu.matmul %0, %42, %cst_16 {dimension_numbers = #tpu.dot_dimension_numbers<[1], [0], [0], [1], [0, 0, 1, 1], [], []>} : vector<16x16xbf16>, vector<16x128xbf16>, vector<16x128xf32> -> vector<16x128xf32>
    %44 = vector.shape_cast %40 : vector<16x128xf32> to vector<1x16x128xf32>
    %45 = vector.shape_cast %43 : vector<16x128xf32> to vector<1x16x128xf32>
    %46 = tpu.concatenate %44, %45 in 0 : vector<1x16x128xf32>, vector<1x16x128xf32> -> vector<2x16x128xf32>
    %47 = arith.truncf %46 : vector<2x16x128xf32> to vector<2x16x128xbf16>
    %48 = vector.shape_cast %47 : vector<2x16x128xbf16> to vector<32x128xbf16>
    %c0_17 = arith.constant 0 : index
    %c0_18 = arith.constant 0 : index
    %49 = vector.load %arg5[%c0_17, %c0_18] : memref<128x128xbf16, #tpu.memory_space<vmem>>, vector<128x128xbf16>
    %cst_19 = arith.constant dense<0.000000e+00> : vector<32x128xf32>
    %50 = tpu.matmul %48, %49, %cst_19 {dimension_numbers = #tpu.dot_dimension_numbers<[1], [0], [0], [1], [0, 0, 1, 1], [], []>} : vector<32x128xbf16>, vector<128x128xbf16>, vector<32x128xf32> -> vector<32x128xf32>
    %51 = vector.shape_cast %50 : vector<32x128xf32> to vector<2x16x128xf32>
    %cst_20 = arith.constant 2.000000e-01 : f32
    %52 = vector.broadcast %cst_20 : f32 to vector<2x16x128xf32>
    %53 = arith.mulf %52, %51 : vector<2x16x128xf32>
    %54 = arith.maximumf %51, %53 : vector<2x16x128xf32>
    %c0_21 = arith.constant 0 : index
    %c0_22 = arith.constant 0 : index
    %c0_23 = arith.constant 0 : index
    %55 = vector.load %arg6[%c0_21, %c0_22, %c0_23] : memref<2x16x128xf32, #tpu.memory_space<vmem>>, vector<2x16x128xf32>
    tpu.vector_store %arg6[%c0_21, %c0_22, %c0_23], %54 {strides = array<i32>} : memref<2x16x128xf32, #tpu.memory_space<vmem>>, vector<2x16x128xf32>,
    return
  }
  func.func @transform_0(%arg0: i32) -> (i32, i32, i32) {
    %c0_i32 = arith.constant 0 : i32
    %c0_i32_0 = arith.constant 0 : i32
    %c0_i32_1 = arith.constant 0 : i32
    return %arg0, %c0_i32, %c0_i32_0 : i32, i32, i32
  }
  func.func @transform_1(%arg0: i32) -> (i32, i32) {
    %c0_i32 = arith.constant 0 : i32
    %c0_i32_0 = arith.constant 0 : i32
    %c0_i32_1 = arith.constant 0 : i32
    return %c0_i32, %c0_i32_0 : i32, i32
  }
  func.func @transform_2(%arg0: i32) -> (i32, i32) {
    %c0_i32 = arith.constant 0 : i32
    %c0_i32_0 = arith.constant 0 : i32
    %c0_i32_1 = arith.constant 0 : i32
    return %c0_i32, %c0_i32_0 : i32, i32
  }
  func.func @transform_3(%arg0: i32) -> (i32, i32) {
    %c0_i32 = arith.constant 0 : i32
    %c0_i32_0 = arith.constant 0 : i32
    %c0_i32_1 = arith.constant 0 : i32
    return %c0_i32, %c0_i32_0 : i32, i32
  }
  func.func @transform_4(%arg0: i32) -> (i32, i32) {
    %c0_i32 = arith.constant 0 : i32
    %c0_i32_0 = arith.constant 0 : i32
    %c0_i32_1 = arith.constant 0 : i32
    return %c0_i32, %c0_i32_0 : i32, i32
  }
  func.func @transform_5(%arg0: i32) -> (i32, i32, i32) {
    %c0_i32 = arith.constant 0 : i32
    %c0_i32_0 = arith.constant 0 : i32
    %c0_i32_1 = arith.constant 0 : i32
    return %arg0, %c0_i32, %c0_i32_0 : i32, i32, i32
  }
}

</mosaic_0001>

<bundles_post_ra>
// kernel: tpu_custom_call.1
= control target key start
LH: loop header
LB: loop body
LE: loop exit
PB: predicated region body
PF: predicated region fallthrough
CT: control target
= control target key end

     0   :  { %10 = vsyncpa [#allocation3], 0  ;;  %s1284_s0 = inlined_call_operand.hbm [shape: bf16[2,16,128], index: 0, kind: input, shape index: {}]   ;;  %s1285_s1 = inlined_call_operand.hbm [shape: bf16[16,16], index: 1, kind: input, shape index: {}]   ;;  %s1286_s2 = inlined_call_operand.hbm [shape: bf16[128,128], index: 2, kind: input, shape index: {}]   ;;  %s1287_s3 = inlined_call_operand.hbm [shape: bf16[128,128], index: 3, kind: input, shape index: {}]   ;;  %s1288_s4 = inlined_call_operand.hbm [shape: bf16[128,128], index: 4, kind: input, shape index: {}]   ;;  %s1289_s5 = inlined_call_operand.hbm [shape: f32[2,16,128], index: 5, kind: output, shape index: {}]  }
   0x1   :  { %11 = vsyncpa [#allocation6], 0 }
   0x2   :  { %12 = vsyncpa [#allocation9], 0 }
   0x3   :  { %13 = vsyncpa [#allocation4], 0  ;;  %s1109_s18 = smov [#allocation5]   ;;  %s1110_s20 = smov [#allocation8]  }
   0x4   :  { %s31_s19 = sshll.u32 %s1109_s18, 4  ;;  %s55_s21 = sshll.u32 %s1110_s20, 4  ;;  %s32_s19 = int_to_ptr.vmem [resolvable:$true] %s31_s19  ;;  %s1151_s21 = int_to_ptr.vmem [resolvable:$true] %s55_s21 }
   0x5   :  { %s969_s24 = scalar_lea.hbm %s1285_s1, 128 }
   0x6   :  { %p970_p0 = scmp.ne.s32.totalorder %s1285_s1, %s969_s24  ;;  %p973_p1 = scmp.lt.u32.totalorder %s969_s24, %s1285_s1 }
   0x8   :  { %p975_p2 = pnand %p973_p1, %p970_p0 }
   0xa   :  { %978 = shalt.err (!%p975_p2)
}
   0xb   :  { %s979_s29 = scalar_lea.vmem %s32_s19, 128  ;;  %p984_p4 = scmp.lt.s32.totalorder %s32_s19, %s32_s19 }
   0xc   :  { %p980_p3 = scmp.ne.s32.totalorder %s32_s19, %s979_s29  ;;  %p985_p5 = scmp.lt.s32.totalorder %s979_s29, %s979_s29 }
   0xe   :  { %p986_p6 = por %p985_p5, %p984_p4 }
  0x10   :  { %p987_p7 = pnand %p986_p6, %p980_p3 }
  0x12   :  { %990 = shalt.err (!%p987_p7)
}
  0x13   :  { %s1111_s30 = smov 64   ;;  %s1112_s6 = smov 4  }
  0x14   :  { %37 = dma.hbm_to_vmem [thread:$0]  %s1285_s1, 128, %s32_s19, [#allocation6], %s1111_s30, %s1111_s30, %s1112_s6  }
  0x15   :  { %s991_s11 = scalar_lea.hbm %s1287_s3, 1024 }
  0x16   :  { %p992_p8 = scmp.ne.s32.totalorder %s1287_s3, %s991_s11  ;;  %p995_p9 = scmp.lt.u32.totalorder %s991_s11, %s1287_s3 }
  0x18   :  { %p997_p10 = pnand %p995_p9, %p992_p8 }
  0x1a   :  { %1000 = shalt.err (!%p997_p10)
}
  0x1b   :  { %s1001_s16 = scalar_lea.vmem %s1151_s21, 1024  ;;  %p1006_p12 = scmp.lt.s32.totalorder %s1151_s21, %s1151_s21 }
  0x1c   :  { %p1002_p11 = scmp.ne.s32.totalorder %s1151_s21, %s1001_s16  ;;  %p1007_p13 = scmp.lt.s32.totalorder %s1001_s16, %s1001_s16 }
  0x1e   :  { %p1008_p0 = por %p1007_p13, %p1006_p12 }
  0x20   :  { %p1009_p1 = pnand %p1008_p0, %p1002_p11 }
  0x22   :  { %1012 = shalt.err (!%p1009_p1)
}
  0x23   :  { %61 = dma.hbm_to_vmem [thread:$0]  %s1287_s3, 1024, %s1151_s21, [#allocation9], %s1111_s30, %s1111_s30, %s1112_s6  }
  0x24   :  { %s1113_s18 = smov [#allocation2]   ;;  %s1114_s20 = smov [#allocation7]  }
  0x25   :  { %s19_s19 = sshll.u32 %s1113_s18, 4  ;;  %s43_s22 = sshll.u32 %s1114_s20, 4  ;;  %s20_s19 = int_to_ptr.vmem [resolvable:$true] %s19_s19  ;;  %s1188_s22 = int_to_ptr.vmem [resolvable:$true] %s43_s22 }
  0x26   :  { %s1013_s25 = scalar_lea.hbm %s1284_s0, 256 }
  0x27   :  { %p1014_p2 = scmp.ne.s32.totalorder %s1284_s0, %s1013_s25  ;;  %p1017_p3 = scmp.lt.u32.totalorder %s1013_s25, %s1284_s0 }
  0x29   :  { %p1019_p4 = pnand %p1017_p3, %p1014_p2 }
  0x2b   :  { %1022 = shalt.err (!%p1019_p4)
}
  0x2c   :  { %s1023_s3 = scalar_lea.vmem %s20_s19, 256  ;;  %p1028_p6 = scmp.lt.s32.totalorder %s20_s19, %s20_s19 }
  0x2d   :  { %p1024_p5 = scmp.ne.s32.totalorder %s20_s19, %s1023_s3  ;;  %p1029_p7 = scmp.lt.s32.totalorder %s1023_s3, %s1023_s3 }
  0x2f   :  { %p1030_p8 = por %p1029_p7, %p1028_p6 }
  0x31   :  { %p1031_p9 = pnand %p1030_p8, %p1024_p5 }
  0x33   :  { %1034 = shalt.err (!%p1031_p9)
}
  0x34   :  { %25 = dma.hbm_to_vmem [thread:$0]  %s1284_s0, 256, %s20_s19, [#allocation3], %s1111_s30, %s1111_s30, %s1112_s6  }
  0x35   :  { %s1035_s10 = scalar_lea.hbm %s1286_s2, 1024 }
  0x36   :  { %p1036_p10 = scmp.ne.s32.totalorder %s1286_s2, %s1035_s10  ;;  %p1039_p11 = scmp.lt.u32.totalorder %s1035_s10, %s1286_s2 }
  0x38   :  { %p1041_p12 = pnand %p1039_p11, %p1036_p10 }
  0x3a   :  { %1044 = shalt.err (!%p1041_p12)
}
  0x3b   :  { %s1045_s15 = scalar_lea.vmem %s1188_s22, 1024  ;;  %p1050_p0 = scmp.lt.s32.totalorder %s1188_s22, %s1188_s22 }
  0x3c   :  { %p1046_p13 = scmp.ne.s32.totalorder %s1188_s22, %s1045_s15  ;;  %p1051_p1 = scmp.lt.s32.totalorder %s1045_s15, %s1045_s15 }
  0x3e   :  { %p1052_p2 = por %p1051_p1, %p1050_p0 }
  0x40   :  { %p1053_p3 = pnand %p1052_p2, %p1046_p13 }
  0x42   :  { %1056 = shalt.err (!%p1053_p3)
}
  0x43   :  { %49 = dma.hbm_to_vmem [thread:$0]  %s1286_s2, 1024, %s1188_s22, [#allocation6], %s1111_s30, %s1111_s30, %s1112_s6  }
  0x44   :  { %s1115_s1 = smov [#allocation10]   ;;  %s1057_s20 = scalar_lea.hbm %s1288_s4, 1024 }
  0x45   :  { %s67_s17 = sshll.u32 %s1115_s1, 4  ;;  %p1058_p4 = scmp.ne.s32.totalorder %s1288_s4, %s1057_s20  ;;  %s68_s17 = int_to_ptr.vmem [resolvable:$true] %s67_s17 }
  0x46   :  { %p1061_p5 = scmp.lt.u32.totalorder %s1057_s20, %s1288_s4 }
  0x48   :  { %p1063_p6 = pnand %p1061_p5, %p1058_p4 }
  0x4a   :  { %1066 = shalt.err (!%p1063_p6)
}
  0x4b   :  { %s1067_s27 = scalar_lea.vmem %s68_s17, 1024  ;;  %p1072_p8 = scmp.lt.s32.totalorder %s68_s17, %s68_s17 }
  0x4c   :  { %p1068_p7 = scmp.ne.s32.totalorder %s68_s17, %s1067_s27  ;;  %p1073_p9 = scmp.lt.s32.totalorder %s1067_s27, %s1067_s27 }
  0x4e   :  { %p1074_p10 = por %p1073_p9, %p1072_p8 }
  0x50   :  { %p1075_p11 = pnand %p1074_p10, %p1068_p7 }
  0x52   :  { %1078 = shalt.err (!%p1075_p11)
}
  0x53   :  { %73 = dma.hbm_to_vmem [thread:$0]  %s1288_s4, 1024, %s68_s17, [#allocation9], %s1111_s30, %s1111_s30, %s1112_s6  }
  0x54   :  { %1101 = dma.done.wait [#allocation3], 256  }
  0x55   :  { %1102 = vsyncadd [#allocation3], 4294967040 }
  0x56   :  { %1103 = dma.done.wait [#allocation6], 1152  }
  0x57   :  { %1104 = vsyncadd [#allocation6], 4294966144 }
  0x58   :  { %1105 = dma.done.wait [#allocation9], 2048  }
  0x59   :  { %1106 = vsyncadd [#allocation9], 4294965248  ;;  %v1116_v0 = vmov 0.0   ;;  %vm1117_vm0 = vmmov 0   ;;  %v942_v1 = vld [vmem:[#allocation2] sm:$0xff]   ;;  %v943_v2 = vld [vmem:[#allocation2 + $0x8] sm:$0xff]  }
  0x5a   :  { %834 = vmatprep.subr.bf16.mxu0 %v1116_v0  ;;  %840 = vmatprep.subr.bf16.mxu1 %v1116_v0  ;;  %v1246_v3 = vld [vmem:[#allocation5] sm:$0xff]   ;;  %vm107_vm1 = vcmask 130048   ;;  %v945_v4 = vld [vmem:[#allocation7] sm:$0xff]   ;;  %v946_v5 = vld [vmem:[#allocation7 + $0x8] sm:$0xff]   ;;  %s1118_s4 = smov [#allocation11]  }
  0x5b   :  { %836 = vmatprep.mubr.msk.bf16.mxu0 %vm1117_vm0, %v1116_v0  ;;  %842 = vmatprep.mubr.msk.bf16.mxu1 %vm1117_vm0, %v1116_v0  ;;  %v947_v6 = vld [vmem:[#allocation7 + $0x10] sm:$0xff]   ;;  %v948_v7 = vld [vmem:[#allocation7 + $0x18] sm:$0xff]   ;;  %v949_v8 = vld [vmem:[#allocation7 + $0x20] sm:$0xff]   ;;  %s745_s30 = sshll.u32 %s1118_s4, 4  ;;  %s746_s30 = int_to_ptr.vmem [resolvable:$true] %s745_s30 }
  0x5c   :  { %835 = vmatpush3.bf16.msra.mxu0 %v942_v1  ;;  %841 = vmatpush3.bf16.msra.mxu1 %v943_v2  ;;  %v950_v9 = vld [vmem:[#allocation7 + $0x28] sm:$0xff]   ;;  %v951_v10 = vld [vmem:[#allocation7 + $0x30] sm:$0xff]   ;;  %v952_v11 = vld [vmem:[#allocation7 + $0x38] sm:$0xff]   ;;  %s1079_s6 = scalar_lea.vmem %s746_s30, 512  ;;  %p1084_p13 = scmp.lt.s32.totalorder %s746_s30, %s746_s30 }
  0x5d   :  { %846 = vmatprep.subr.bf16.mxu0 %v945_v4  ;;  %v953_v12 = vld [vmem:[#allocation8] sm:$0xff]   ;;  %v954_v13 = vld [vmem:[#allocation8 + $0x8] sm:$0xff]   ;;  %v955_v14 = vld [vmem:[#allocation8 + $0x10] sm:$0xff]   ;;  %p1080_p12 = scmp.ne.s32.totalorder %s746_s30, %s1079_s6  ;;  %p1085_p0 = scmp.lt.s32.totalorder %s1079_s6, %s1079_s6 }
  0x5e   :  { %866 = vmatprep.subr.bf16.mxu1 %v953_v12  ;;  %v956_v15 = vld [vmem:[#allocation8 + $0x18] sm:$0xff]   ;;  %v957_v16 = vld [vmem:[#allocation8 + $0x20] sm:$0xff]   ;;  %v958_v17 = vld [vmem:[#allocation8 + $0x28] sm:$0xff]  }
  0x5f   :  { %837 = vmatmul.mubr.msk.bf16.vlgmr.msra.gmra.mrb[0].mxu0 %vm107_vm1, %v1246_v3  ;;  %843 = vmatmul.mubr.msk.bf16.vlgmr.msra.gmra.mrb[0].mxu1 %vm107_vm1, %v1246_v3  ;;  %v959_v28 = vld [vmem:[#allocation8 + $0x30] sm:$0xff]   ;;  %v960_v29 = vld [vmem:[#allocation8 + $0x38] sm:$0xff]   ;;  %v961_v50 = vld [vmem:[#allocation10] sm:$0xff]   ;;  %p1086_p1 = por %p1085_p0, %p1084_p13 }
  0x60   :  { %847 = vmatpush3.bf16.msra.mxu0 %v945_v4  ;;  %867 = vmatpush3.bf16.msra.mxu1 %v953_v12  ;;  %v962_v51 = vld [vmem:[#allocation10 + $0x8] sm:$0xff]   ;;  %v963_v52 = vld [vmem:[#allocation10 + $0x10] sm:$0xff]   ;;  %v964_v53 = vld [vmem:[#allocation10 + $0x18] sm:$0xff]  }
  0x61   :  { %848 = vmatprep.subr.bf16.mxu0 %v946_v5  ;;  %868 = vmatprep.subr.bf16.mxu1 %v954_v13  ;;  %v965_v54 = vld [vmem:[#allocation10 + $0x20] sm:$0xff]   ;;  %v966_v55 = vld [vmem:[#allocation10 + $0x28] sm:$0xff]   ;;  %v967_v12 = vld [vmem:[#allocation10 + $0x30] sm:$0xff]   ;;  %p1087_p2 = pnand %p1086_p1, %p1080_p12 }
  0x64   :  { %849 = vmatpush3.bf16.msra.mxu0 %v946_v5  ;;  %869 = vmatpush3.bf16.msra.mxu1 %v954_v13  ;;  %v968_v13 = vld [vmem:[#allocation10 + $0x38] sm:$0xff]  }
  0x65   :  { %850 = vmatprep.subr.bf16.mxu0 %v947_v6  ;;  %870 = vmatprep.subr.bf16.mxu1 %v955_v14 }
  0x68   :  { %851 = vmatpush3.bf16.msra.mxu0 %v947_v6  ;;  %871 = vmatpush3.bf16.msra.mxu1 %v955_v14 }
  0x69   :  { %852 = vmatprep.subr.bf16.mxu0 %v948_v7  ;;  %872 = vmatprep.subr.bf16.mxu1 %v956_v15 }
  0x6c   :  { %853 = vmatpush3.bf16.msra.mxu0 %v948_v7  ;;  %873 = vmatpush3.bf16.msra.mxu1 %v956_v15 }
  0x6d   :  { %854 = vmatprep.subr.bf16.mxu0 %v949_v8  ;;  %874 = vmatprep.subr.bf16.mxu1 %v957_v16 }
  0x70   :  { %855 = vmatpush3.bf16.msra.mxu0 %v949_v8  ;;  %875 = vmatpush3.bf16.msra.mxu1 %v957_v16 }
  0x71   :  { %856 = vmatprep.subr.bf16.mxu0 %v950_v9  ;;  %876 = vmatprep.subr.bf16.mxu1 %v958_v17 }
  0x74   :  { %857 = vmatpush3.bf16.msra.mxu0 %v950_v9  ;;  %877 = vmatpush3.bf16.msra.mxu1 %v958_v17 }
  0x75   :  { %858 = vmatprep.subr.bf16.mxu0 %v951_v10  ;;  %878 = vmatprep.subr.bf16.mxu1 %v959_v28 }
  0x78   :  { %859 = vmatpush3.bf16.msra.mxu0 %v951_v10  ;;  %879 = vmatpush3.bf16.msra.mxu1 %v959_v28 }
  0x79   :  { %860 = vmatprep.subr.bf16.mxu0 %v952_v11  ;;  %880 = vmatprep.subr.bf16.mxu1 %v960_v29 }
  0x7c   :  { %861 = vmatpush3.bf16.msra.mxu0 %v952_v11  ;;  %881 = vmatpush3.bf16.msra.mxu1 %v960_v29 }
  0x7d   :  { %886 = vmatprep.subr.bf16.mxu1 %v1116_v0  ;;  %910 = vmatprep.subr.bf16.mxu0 %v961_v50 }
 0x132   :  { %v145_v18 = vpop.f32.mrb[0].mxu0  ;;  %v192_v19 = vpop.f32.mrb[0].mxu1 }
 0x133   :  { %v838_v20 = vpop.f32.mrb[1].mxu0  ;;  %v844_v21 = vpop.f32.mrb[1].mxu1 }
 0x134   :  { %v148_v22 = vpop.f32.mrb[2].mxu0  ;;  %v195_v24 = vpop.f32.mrb[2].mxu1 }
 0x135   :  { %v199_v23 = vpack.c.bf16 %v148_v22, %v145_v18  ;;  %v839_v25 = vpop.f32.mrb[3].mxu0  ;;  %v200_v26 = vpack.c.bf16 %v195_v24, %v192_v19  ;;  %v845_v27 = vpop.f32.mrb[3].mxu1 }
 0x137   :  { %862 = vmatprep.mubr.bf16.mxu0 %v199_v23 }
 0x138   :  { %863 = vmatmul.mubr.bf16.vlgmr.msra.gmra.mrb[4].mxu0 %v200_v26 }
 0x139   :  { %911 = vmatpush3.bf16.msra.mxu0 %v961_v50 }
 0x13a   :  { %912 = vmatprep.subr.bf16.mxu0 %v962_v51 }
 0x13d   :  { %913 = vmatpush3.bf16.msra.mxu0 %v962_v51 }
 0x13e   :  { %914 = vmatprep.subr.bf16.mxu0 %v963_v52 }
 0x141   :  { %915 = vmatpush3.bf16.msra.mxu0 %v963_v52 }
 0x142   :  { %916 = vmatprep.subr.bf16.mxu0 %v964_v53 }
 0x145   :  { %917 = vmatpush3.bf16.msra.mxu0 %v964_v53 }
 0x146   :  { %918 = vmatprep.subr.bf16.mxu0 %v965_v54 }
 0x149   :  { %919 = vmatpush3.bf16.msra.mxu0 %v965_v54 }
 0x14a   :  { %920 = vmatprep.subr.bf16.mxu0 %v966_v55 }
 0x14d   :  { %921 = vmatpush3.bf16.msra.mxu0 %v966_v55 }
 0x14e   :  { %922 = vmatprep.subr.bf16.mxu0 %v967_v12 }
 0x151   :  { %923 = vmatpush3.bf16.msra.mxu0 %v967_v12 }
 0x152   :  { %924 = vmatprep.subr.bf16.mxu0 %v968_v13 }
 0x155   :  { %925 = vmatpush3.bf16.msra.mxu0 %v968_v13 }
 0x20b   :  { %v864_v30 = vpop.f32.mrb[4].mxu0 }
 0x20c   :  { %v316_v31 = vmul.f32 0.2, %v864_v30  ;;  %v299_v32 = vpop.f32.mrb[5].mxu0 }
 0x20d   :  { %v314_v33 = vmul.f32 0.2, %v299_v32  ;;  %v865_v34 = vpop.f32.mrb[6].mxu0 }
 0x20e   :  { %v317_v35 = vmul.f32 0.2, %v865_v34  ;;  %v302_v36 = vpop.f32.mrb[7].mxu0  ;;  %v320_v38 = vmax.f32 %v864_v30, %v316_v31 }
 0x20f   :  { %v315_v37 = vmul.f32 0.2, %v302_v36  ;;  %v318_v40 = vmax.f32 %v299_v32, %v314_v33 }
 0x210   :  { %v321_v39 = vmax.f32 %v865_v34, %v317_v35 }
 0x211   :  { %v319_v41 = vmax.f32 %v302_v36, %v315_v37 }
 0x212   :  { %v323_v42 = vpack.c.bf16 %v321_v39, %v320_v38 }
 0x213   :  { %v322_v43 = vpack.c.bf16 %v319_v41, %v318_v40 }
 0x215   :  { %882 = vmatprep.mubr.bf16.mxu1 %v322_v43 }
 0x216   :  { %883 = vmatmul.mubr.bf16.vlgmr.msra.gmra.mrb[4].mxu1 %v323_v42 }
 0x217   :  { %888 = vmatprep.mubr.msk.bf16.mxu1 %vm1117_vm0, %v1116_v0 }
 0x2e9   :  { %v884_v44 = vpop.f32.mrb[4].mxu1 }
 0x2ea   :  { %v422_v45 = vpop.f32.mrb[5].mxu1 }
 0x2eb   :  { %v885_v46 = vpop.f32.mrb[6].mxu1 }
 0x2ec   :  { %v438_v47 = vpack.c.bf16 %v885_v46, %v884_v44  ;;  %v425_v48 = vpop.f32.mrb[7].mxu1 }
 0x2ed   :  { %v437_v49 = vpack.c.bf16 %v425_v48, %v422_v45 }
 0x2ef   :  { %887 = vmatpush3.bf16.msra.mxu1 %v437_v49 }
 0x2f0   :  { %892 = vmatprep.subr.bf16.mxu1 %v1116_v0 }
 0x2f2   :  { %889 = vmatmul.mubr.msk.bf16.vlgmr.msra.gmra.mrb[8].mxu1 %vm107_vm1, %v1246_v3 }
 0x2f3   :  { %893 = vmatpush3.bf16.msra.mxu1 %v438_v47  ;;  %894 = vmatprep.mubr.msk.bf16.mxu1 %vm1117_vm0, %v1116_v0 }
 0x2f4   :  { %898 = vmatprep.subr.bf16.mxu1 %v1116_v0 }
 0x2fa   :  { %895 = vmatmul.mubr.msk.bf16.vlgmr.msra.gmra.mrb[12].mxu1 %vm107_vm1, %v1246_v3 }
 0x2fb   :  { %900 = vmatprep.mubr.msk.bf16.mxu1 %vm1117_vm0, %v1116_v0 }
 0x3c5   :  { %v473_v56 = vpop.f32.mrb[8].mxu1 }
 0x3c6   :  { %v521_v57 = vmul.f32 0.2, %v473_v56  ;;  %v890_v58 = vpop.f32.mrb[9].mxu1 }
 0x3c7   :  { %v476_v59 = vpop.f32.mrb[10].mxu1 }
 0x3c8   :  { %v522_v60 = vmul.f32 0.2, %v476_v59  ;;  %v891_v61 = vpop.f32.mrb[11].mxu1  ;;  %v525_v62 = vmax.f32 %v473_v56, %v521_v57 }
 0x3ca   :  { %v526_v63 = vmax.f32 %v476_v59, %v522_v60 }
 0x3cc   :  { %v529_v1 = vpack.c.bf16 %v526_v63, %v525_v62 }
 0x3cd   :  { %v514_v2 = vpop.f32.mrb[12].mxu1 }
 0x3ce   :  { %v523_v4 = vmul.f32 0.2, %v514_v2  ;;  %v896_v5 = vpop.f32.mrb[13].mxu1  ;;  %899 = vmatpush3.bf16.msra.mxu1 %v529_v1 }
 0x3cf   :  { %v517_v6 = vpop.f32.mrb[14].mxu1  ;;  %904 = vmatprep.subr.bf16.mxu1 %v1116_v0 }
 0x3d0   :  { %v524_v7 = vmul.f32 0.2, %v517_v6  ;;  %v897_v8 = vpop.f32.mrb[15].mxu1  ;;  %v527_v9 = vmax.f32 %v514_v2, %v523_v4 }
 0x3d1   :  { %901 = vmatmul.mubr.msk.bf16.vlgmr.msra.gmra.mrb[16].mxu1 %vm107_vm1, %v1246_v3 }
 0x3d2   :  { %v528_v10 = vmax.f32 %v517_v6, %v524_v7  ;;  %906 = vmatprep.mubr.msk.bf16.mxu1 %vm1117_vm0, %v1116_v0 }
 0x3d4   :  { %v530_v11 = vpack.c.bf16 %v528_v10, %v527_v9 }
 0x3d6   :  { %905 = vmatpush3.bf16.msra.mxu1 %v530_v11 }
 0x3d9   :  { %907 = vmatmul.mubr.msk.bf16.vlgmr.msra.gmra.mrb[20].mxu1 %vm107_vm1, %v1246_v3 }
 0x4a4   :  { %v565_v14 = vpop.f32.mrb[16].mxu1 }
 0x4a5   :  { %v902_v15 = vpop.f32.mrb[17].mxu1 }
 0x4a6   :  { %v568_v16 = vpop.f32.mrb[18].mxu1 }
 0x4a7   :  { %v613_v17 = vpack.c.bf16 %v568_v16, %v565_v14  ;;  %v903_v18 = vpop.f32.mrb[19].mxu1 }
 0x4a9   :  { %926 = vmatprep.mubr.bf16.mxu0 %v613_v17 }
 0x4ac   :  { %v606_v19 = vpop.f32.mrb[20].mxu1 }
 0x4ad   :  { %v908_v20 = vpop.f32.mrb[21].mxu1 }
 0x4ae   :  { %v609_v0 = vpop.f32.mrb[22].mxu1 }
 0x4af   :  { %v614_v21 = vpack.c.bf16 %v609_v0, %v606_v19  ;;  %v909_v22 = vpop.f32.mrb[23].mxu1 }
 0x4b1   :  { %927 = vmatmul.mubr.bf16.vlgmr.msra.gmra.mrb[8].mxu0 %v614_v21 }
 0x584   :  { %v928_v23 = vpop.f32.mrb[8].mxu0 }
 0x585   :  { %v730_v3 = vmul.f32 0.2, %v928_v23  ;;  %v713_v24 = vpop.f32.mrb[9].mxu0 }
 0x586   :  { %v728_v25 = vmul.f32 0.2, %v713_v24  ;;  %v929_v26 = vpop.f32.mrb[10].mxu0 }
 0x587   :  { %v734_v27 = vmax.f32 %v928_v23, %v730_v3  ;;  %v731_v28 = vmul.f32 0.2, %v929_v26  ;;  %v716_v29 = vpop.f32.mrb[11].mxu0 }
 0x588   :  { %v732_v30 = vmax.f32 %v713_v24, %v728_v25  ;;  %v729_v31 = vmul.f32 0.2, %v716_v29 }
 0x589   :  { %738 = vst [vmem:[#allocation11 + $0x10] sm:$0xff] %v734_v27  ;;  %v735_v32 = vmax.f32 %v929_v26, %v731_v28 }
 0x58a   :  { %736 = vst [vmem:[#allocation11] sm:$0xff] %v732_v30  ;;  %v733_v33 = vmax.f32 %v716_v29, %v729_v31 }
 0x58b   :  { %739 = vst [vmem:[#allocation11 + $0x18] sm:$0xff] %v735_v32 }
 0x58c   :  { %737 = vst [vmem:[#allocation11 + $0x8] sm:$0xff] %v733_v33 }
 0x58d   :  { %1090 = shalt.err (!%p1087_p2)
}
 0x58e   :  { %s1091_s3 = scalar_lea.hbm %s1289_s5, 512 }
 0x58f   :  { %p1092_p3 = scmp.ne.s32.totalorder %s1289_s5, %s1091_s3  ;;  %p1095_p4 = scmp.lt.u32.totalorder %s1091_s3, %s1289_s5 }
 0x591   :  { %p1097_p5 = pnand %p1095_p4, %p1092_p3 }
 0x593   :  { %1100 = shalt.err (!%p1097_p5)
}
 0x594   :  { %s1119_s10 = smov 128   ;;  %s1120_s11 = smov 8  }
 0x595   :  { %751 = dma.vmem_to_hbm [thread:$0]  %s746_s30, 512, %s1289_s5, [#allocation4], %s1119_s10, %s1119_s10, %s1120_s11  }
 0x596   :  { %1107 = dma.done.wait [#allocation4], 512  }
 0x597   :  { %1108 = vsyncadd [#allocation4], 4294966784 }
 0x598   :  { %755 = vsyncpa [#allocation3], 1 }
 0x599   :  { %756 = vsyncpa [#allocation6], 1 }
 0x59a   :  { %757 = vsyncpa [#allocation9], 1 }
 0x59b   :  { %758 = vsyncpa [#allocation4], 1 }

// kernel: tpu_custom_call.1
= control target key start
LH: loop header
LB: loop body
LE: loop exit
PB: predicated region body
PF: predicated region fallthrough
CT: control target
= control target key end

     0   :  { %10 = vsyncpa [#allocation3], 0  ;;  %s1284_s0 = inlined_call_operand.hbm [shape: bf16[2,16,128], index: 0, kind: input, shape index: {}]   ;;  %s1285_s1 = inlined_call_operand.hbm [shape: bf16[16,16], index: 1, kind: input, shape index: {}]   ;;  %s1286_s2 = inlined_call_operand.hbm [shape: bf16[128,128], index: 2, kind: input, shape index: {}]   ;;  %s1287_s3 = inlined_call_operand.hbm [shape: bf16[128,128], index: 3, kind: input, shape index: {}]   ;;  %s1288_s4 = inlined_call_operand.hbm [shape: bf16[128,128], index: 4, kind: input, shape index: {}]   ;;  %s1289_s5 = inlined_call_operand.hbm [shape: f32[2,16,128], index: 5, kind: output, shape index: {}]  }
   0x1   :  { %11 = vsyncpa [#allocation6], 0 }
   0x2   :  { %12 = vsyncpa [#allocation9], 0 }
   0x3   :  { %13 = vsyncpa [#allocation4], 0  ;;  %s1109_s18 = smov [#allocation5]   ;;  %s1110_s20 = smov [#allocation8]  }
   0x4   :  { %s31_s19 = sshll.u32 %s1109_s18, 4  ;;  %s55_s21 = sshll.u32 %s1110_s20, 4  ;;  %s32_s19 = int_to_ptr.vmem [resolvable:$true] %s31_s19  ;;  %s1151_s21 = int_to_ptr.vmem [resolvable:$true] %s55_s21 }
   0x5   :  { %s969_s24 = scalar_lea.hbm %s1285_s1, 128 }
   0x6   :  { %p970_p0 = scmp.ne.s32.totalorder %s1285_s1, %s969_s24  ;;  %p973_p1 = scmp.lt.u32.totalorder %s969_s24, %s1285_s1 }
   0x8   :  { %p975_p2 = pnand %p973_p1, %p970_p0 }
   0xa   :  { %978 = shalt.err (!%p975_p2)
}
   0xb   :  { %s979_s29 = scalar_lea.vmem %s32_s19, 128  ;;  %p984_p4 = scmp.lt.s32.totalorder %s32_s19, %s32_s19 }
   0xc   :  { %p980_p3 = scmp.ne.s32.totalorder %s32_s19, %s979_s29  ;;  %p985_p5 = scmp.lt.s32.totalorder %s979_s29, %s979_s29 }
   0xe   :  { %p986_p6 = por %p985_p5, %p984_p4 }
  0x10   :  { %p987_p7 = pnand %p986_p6, %p980_p3 }
  0x12   :  { %990 = shalt.err (!%p987_p7)
}
  0x13   :  { %s1111_s30 = smov 64   ;;  %s1112_s6 = smov 4  }
  0x14   :  { %37 = dma.hbm_to_vmem [thread:$0]  %s1285_s1, 128, %s32_s19, [#allocation6], %s1111_s30, %s1111_s30, %s1112_s6  }
  0x15   :  { %s991_s11 = scalar_lea.hbm %s1287_s3, 1024 }
  0x16   :  { %p992_p8 = scmp.ne.s32.totalorder %s1287_s3, %s991_s11  ;;  %p995_p9 = scmp.lt.u32.totalorder %s991_s11, %s1287_s3 }
  0x18   :  { %p997_p10 = pnand %p995_p9, %p992_p8 }
  0x1a   :  { %1000 = shalt.err (!%p997_p10)
}
  0x1b   :  { %s1001_s16 = scalar_lea.vmem %s1151_s21, 1024  ;;  %p1006_p12 = scmp.lt.s32.totalorder %s1151_s21, %s1151_s21 }
  0x1c   :  { %p1002_p11 = scmp.ne.s32.totalorder %s1151_s21, %s1001_s16  ;;  %p1007_p13 = scmp.lt.s32.totalorder %s1001_s16, %s1001_s16 }
  0x1e   :  { %p1008_p0 = por %p1007_p13, %p1006_p12 }
  0x20   :  { %p1009_p1 = pnand %p1008_p0, %p1002_p11 }
  0x22   :  { %1012 = shalt.err (!%p1009_p1)
}
  0x23   :  { %61 = dma.hbm_to_vmem [thread:$0]  %s1287_s3, 1024, %s1151_s21, [#allocation9], %s1111_s30, %s1111_s30, %s1112_s6  }
  0x24   :  { %s1113_s18 = smov [#allocation2]   ;;  %s1114_s20 = smov [#allocation7]  }
  0x25   :  { %s19_s19 = sshll.u32 %s1113_s18, 4  ;;  %s43_s22 = sshll.u32 %s1114_s20, 4  ;;  %s20_s19 = int_to_ptr.vmem [resolvable:$true] %s19_s19  ;;  %s1188_s22 = int_to_ptr.vmem [resolvable:$true] %s43_s22 }
  0x26   :  { %s1013_s25 = scalar_lea.hbm %s1284_s0, 256 }
  0x27   :  { %p1014_p2 = scmp.ne.s32.totalorder %s1284_s0, %s1013_s25  ;;  %p1017_p3 = scmp.lt.u32.totalorder %s1013_s25, %s1284_s0 }
  0x29   :  { %p1019_p4 = pnand %p1017_p3, %p1014_p2 }
  0x2b   :  { %1022 = shalt.err (!%p1019_p4)
}
  0x2c   :  { %s1023_s3 = scalar_lea.vmem %s20_s19, 256  ;;  %p1028_p6 = scmp.lt.s32.totalorder %s20_s19, %s20_s19 }
  0x2d   :  { %p1024_p5 = scmp.ne.s32.totalorder %s20_s19, %s1023_s3  ;;  %p1029_p7 = scmp.lt.s32.totalorder %s1023_s3, %s1023_s3 }
  0x2f   :  { %p1030_p8 = por %p1029_p7, %p1028_p6 }
  0x31   :  { %p1031_p9 = pnand %p1030_p8, %p1024_p5 }
  0x33   :  { %1034 = shalt.err (!%p1031_p9)
}
  0x34   :  { %25 = dma.hbm_to_vmem [thread:$0]  %s1284_s0, 256, %s20_s19, [#allocation3], %s1111_s30, %s1111_s30, %s1112_s6  }
  0x35   :  { %s1035_s10 = scalar_lea.hbm %s1286_s2, 1024 }
  0x36   :  { %p1036_p10 = scmp.ne.s32.totalorder %s1286_s2, %s1035_s10  ;;  %p1039_p11 = scmp.lt.u32.totalorder %s1035_s10, %s1286_s2 }
  0x38   :  { %p1041_p12 = pnand %p1039_p11, %p1036_p10 }
  0x3a   :  { %1044 = shalt.err (!%p1041_p12)
}
  0x3b   :  { %s1045_s15 = scalar_lea.vmem %s1188_s22, 1024  ;;  %p1050_p0 = scmp.lt.s32.totalorder %s1188_s22, %s1188_s22 }
  0x3c   :  { %p1046_p13 = scmp.ne.s32.totalorder %s1188_s22, %s1045_s15  ;;  %p1051_p1 = scmp.lt.s32.totalorder %s1045_s15, %s1045_s15 }
  0x3e   :  { %p1052_p2 = por %p1051_p1, %p1050_p0 }
  0x40   :  { %p1053_p3 = pnand %p1052_p2, %p1046_p13 }
  0x42   :  { %1056 = shalt.err (!%p1053_p3)
}
  0x43   :  { %49 = dma.hbm_to_vmem [thread:$0]  %s1286_s2, 1024, %s1188_s22, [#allocation6], %s1111_s30, %s1111_s30, %s1112_s6  }
  0x44   :  { %s1115_s1 = smov [#allocation10]   ;;  %s1057_s20 = scalar_lea.hbm %s1288_s4, 1024 }
  0x45   :  { %s67_s17 = sshll.u32 %s1115_s1, 4  ;;  %p1058_p4 = scmp.ne.s32.totalorder %s1288_s4, %s1057_s20  ;;  %s68_s17 = int_to_ptr.vmem [resolvable:$true] %s67_s17 }
  0x46   :  { %p1061_p5 = scmp.lt.u32.totalorder %s1057_s20, %s1288_s4 }
  0x48   :  { %p1063_p6 = pnand %p1061_p5, %p1058_p4 }
  0x4a   :  { %1066 = shalt.err (!%p1063_p6)
}
  0x4b   :  { %s1067_s27 = scalar_lea.vmem %s68_s17, 1024  ;;  %p1072_p8 = scmp.lt.s32.totalorder %s68_s17, %s68_s17 }
  0x4c   :  { %p1068_p7 = scmp.ne.s32.totalorder %s68_s17, %s1067_s27  ;;  %p1073_p9 = scmp.lt.s32.totalorder %s1067_s27, %s1067_s27 }
  0x4e   :  { %p1074_p10 = por %p1073_p9, %p1072_p8 }
  0x50   :  { %p1075_p11 = pnand %p1074_p10, %p1068_p7 }
  0x52   :  { %1078 = shalt.err (!%p1075_p11)
}
  0x53   :  { %73 = dma.hbm_to_vmem [thread:$0]  %s1288_s4, 1024, %s68_s17, [#allocation9], %s1111_s30, %s1111_s30, %s1112_s6  }
  0x54   :  { %1101 = dma.done.wait [#allocation3], 256  }
  0x55   :  { %1102 = vsyncadd [#allocation3], 4294967040 }
  0x56   :  { %1103 = dma.done.wait [#allocation6], 1152  }
  0x57   :  { %1104 = vsyncadd [#allocation6], 4294966144 }
  0x58   :  { %1105 = dma.done.wait [#allocation9], 2048  }
  0x59   :  { %1106 = vsyncadd [#allocation9], 4294965248  ;;  %v1116_v0 = vmov 0.0   ;;  %vm1117_vm0 = vmmov 0   ;;  %v942_v1 = vld [vmem:[#allocation2] sm:$0xff]   ;;  %v943_v2 = vld [vmem:[#allocation2 + $0x8] sm:$0xff]  }
  0x5a   :  { %834 = vmatprep.subr.bf16.mxu0 %v1116_v0  ;;  %840 = vmatprep.subr.bf16.mxu1 %v1116_v0  ;;  %v1246_v3 = vld [vmem:[#allocation5] sm:$0xff]   ;;  %vm107_vm1 = vcmask 130048   ;;  %v945_v4 = vld [vmem:[#allocation7] sm:$0xff]   ;;  %v946_v5 = vld [vmem:[#allocation7 + $0x8] sm:$0xff]   ;;  %s1118_s4 = smov [#allocation11]  }
  0x5b   :  { %836 = vmatprep.mubr.msk.bf16.mxu0 %vm1117_vm0, %v1116_v0  ;;  %842 = vmatprep.mubr.msk.bf16.mxu1 %vm1117_vm0, %v1116_v0  ;;  %v947_v6 = vld [vmem:[#allocation7 + $0x10] sm:$0xff]   ;;  %v948_v7 = vld [vmem:[#allocation7 + $0x18] sm:$0xff]   ;;  %v949_v8 = vld [vmem:[#allocation7 + $0x20] sm:$0xff]   ;;  %s745_s30 = sshll.u32 %s1118_s4, 4  ;;  %s746_s30 = int_to_ptr.vmem [resolvable:$true] %s745_s30 }
  0x5c   :  { %835 = vmatpush3.bf16.msra.mxu0 %v942_v1  ;;  %841 = vmatpush3.bf16.msra.mxu1 %v943_v2  ;;  %v950_v9 = vld [vmem:[#allocation7 + $0x28] sm:$0xff]   ;;  %v951_v10 = vld [vmem:[#allocation7 + $0x30] sm:$0xff]   ;;  %v952_v11 = vld [vmem:[#allocation7 + $0x38] sm:$0xff]   ;;  %s1079_s6 = scalar_lea.vmem %s746_s30, 512  ;;  %p1084_p13 = scmp.lt.s32.totalorder %s746_s30, %s746_s30 }
  0x5d   :  { %846 = vmatprep.subr.bf16.mxu0 %v945_v4  ;;  %v953_v12 = vld [vmem:[#allocation8] sm:$0xff]   ;;  %v954_v13 = vld [vmem:[#allocation8 + $0x8] sm:$0xff]   ;;  %v955_v14 = vld [vmem:[#allocation8 + $0x10] sm:$0xff]   ;;  %p1080_p12 = scmp.ne.s32.totalorder %s746_s30, %s1079_s6  ;;  %p1085_p0 = scmp.lt.s32.totalorder %s1079_s6, %s1079_s6 }
  0x5e   :  { %866 = vmatprep.subr.bf16.mxu1 %v953_v12  ;;  %v956_v15 = vld [vmem:[#allocation8 + $0x18] sm:$0xff]   ;;  %v957_v16 = vld [vmem:[#allocation8 + $0x20] sm:$0xff]   ;;  %v958_v17 = vld [vmem:[#allocation8 + $0x28] sm:$0xff]  }
  0x5f   :  { %837 = vmatmul.mubr.msk.bf16.vlgmr.msra.gmra.mrb[0].mxu0 %vm107_vm1, %v1246_v3  ;;  %843 = vmatmul.mubr.msk.bf16.vlgmr.msra.gmra.mrb[0].mxu1 %vm107_vm1, %v1246_v3  ;;  %v959_v28 = vld [vmem:[#allocation8 + $0x30] sm:$0xff]   ;;  %v960_v29 = vld [vmem:[#allocation8 + $0x38] sm:$0xff]   ;;  %v961_v50 = vld [vmem:[#allocation10] sm:$0xff]   ;;  %p1086_p1 = por %p1085_p0, %p1084_p13 }
  0x60   :  { %847 = vmatpush3.bf16.msra.mxu0 %v945_v4  ;;  %867 = vmatpush3.bf16.msra.mxu1 %v953_v12  ;;  %v962_v51 = vld [vmem:[#allocation10 + $0x8] sm:$0xff]   ;;  %v963_v52 = vld [vmem:[#allocation10 + $0x10] sm:$0xff]   ;;  %v964_v53 = vld [vmem:[#allocation10 + $0x18] sm:$0xff]  }
  0x61   :  { %848 = vmatprep.subr.bf16.mxu0 %v946_v5  ;;  %868 = vmatprep.subr.bf16.mxu1 %v954_v13  ;;  %v965_v54 = vld [vmem:[#allocation10 + $0x20] sm:$0xff]   ;;  %v966_v55 = vld [vmem:[#allocation10 + $0x28] sm:$0xff]   ;;  %v967_v12 = vld [vmem:[#allocation10 + $0x30] sm:$0xff]   ;;  %p1087_p2 = pnand %p1086_p1, %p1080_p12 }
  0x64   :  { %849 = vmatpush3.bf16.msra.mxu0 %v946_v5  ;;  %869 = vmatpush3.bf16.msra.mxu1 %v954_v13  ;;  %v968_v13 = vld [vmem:[#allocation10 + $0x38] sm:$0xff]  }
  0x65   :  { %850 = vmatprep.subr.bf16.mxu0 %v947_v6  ;;  %870 = vmatprep.subr.bf16.mxu1 %v955_v14 }
  0x68   :  { %851 = vmatpush3.bf16.msra.mxu0 %v947_v6  ;;  %871 = vmatpush3.bf16.msra.mxu1 %v955_v14 }
  0x69   :  { %852 = vmatprep.subr.bf16.mxu0 %v948_v7  ;;  %872 = vmatprep.subr.bf16.mxu1 %v956_v15 }
  0x6c   :  { %853 = vmatpush3.bf16.msra.mxu0 %v948_v7  ;;  %873 = vmatpush3.bf16.msra.mxu1 %v956_v15 }
  0x6d   :  { %854 = vmatprep.subr.bf16.mxu0 %v949_v8  ;;  %874 = vmatprep.subr.bf16.mxu1 %v957_v16 }
  0x70   :  { %855 = vmatpush3.bf16.msra.mxu0 %v949_v8  ;;  %875 = vmatpush3.bf16.msra.mxu1 %v957_v16 }
  0x71   :  { %856 = vmatprep.subr.bf16.mxu0 %v950_v9  ;;  %876 = vmatprep.subr.bf16.mxu1 %v958_v17 }
  0x74   :  { %857 = vmatpush3.bf16.msra.mxu0 %v950_v9  ;;  %877 = vmatpush3.bf16.msra.mxu1 %v958_v17 }
  0x75   :  { %858 = vmatprep.subr.bf16.mxu0 %v951_v10  ;;  %878 = vmatprep.subr.bf16.mxu1 %v959_v28 }
  0x78   :  { %859 = vmatpush3.bf16.msra.mxu0 %v951_v10  ;;  %879 = vmatpush3.bf16.msra.mxu1 %v959_v28 }
  0x79   :  { %860 = vmatprep.subr.bf16.mxu0 %v952_v11  ;;  %880 = vmatprep.subr.bf16.mxu1 %v960_v29 }
  0x7c   :  { %861 = vmatpush3.bf16.msra.mxu0 %v952_v11  ;;  %881 = vmatpush3.bf16.msra.mxu1 %v960_v29 }
  0x7d   :  { %886 = vmatprep.subr.bf16.mxu1 %v1116_v0  ;;  %910 = vmatprep.subr.bf16.mxu0 %v961_v50 }
 0x132   :  { %v145_v18 = vpop.f32.mrb[0].mxu0  ;;  %v192_v19 = vpop.f32.mrb[0].mxu1 }
 0x133   :  { %v838_v20 = vpop.f32.mrb[1].mxu0  ;;  %v844_v21 = vpop.f32.mrb[1].mxu1 }
 0x134   :  { %v148_v22 = vpop.f32.mrb[2].mxu0  ;;  %v195_v24 = vpop.f32.mrb[2].mxu1 }
 0x135   :  { %v199_v23 = vpack.c.bf16 %v148_v22, %v145_v18  ;;  %v839_v25 = vpop.f32.mrb[3].mxu0  ;;  %v200_v26 = vpack.c.bf16 %v195_v24, %v192_v19  ;;  %v845_v27 = vpop.f32.mrb[3].mxu1 }
 0x137   :  { %862 = vmatprep.mubr.bf16.mxu0 %v199_v23 }
 0x138   :  { %863 = vmatmul.mubr.bf16.vlgmr.msra.gmra.mrb[4].mxu0 %v200_v26 }
 0x139   :  { %911 = vmatpush3.bf16.msra.mxu0 %v961_v50 }
 0x13a   :  { %912 = vmatprep.subr.bf16.mxu0 %v962_v51 }
 0x13d   :  { %913 = vmatpush3.bf16.msra.mxu0 %v962_v51 }
 0x13e   :  { %914 = vmatprep.subr.bf16.mxu0 %v963_v52 }
 0x141   :  { %915 = vmatpush3.bf16.msra.mxu0 %v963_v52 }
 0x142   :  { %916 = vmatprep.subr.bf16.mxu0 %v964_v53 }
 0x145   :  { %917 = vmatpush3.bf16.msra.mxu0 %v964_v53 }
 0x146   :  { %918 = vmatprep.subr.bf16.mxu0 %v965_v54 }
 0x149   :  { %919 = vmatpush3.bf16.msra.mxu0 %v965_v54 }
 0x14a   :  { %920 = vmatprep.subr.bf16.mxu0 %v966_v55 }
 0x14d   :  { %921 = vmatpush3.bf16.msra.mxu0 %v966_v55 }
 0x14e   :  { %922 = vmatprep.subr.bf16.mxu0 %v967_v12 }
 0x151   :  { %923 = vmatpush3.bf16.msra.mxu0 %v967_v12 }
 0x152   :  { %924 = vmatprep.subr.bf16.mxu0 %v968_v13 }
 0x155   :  { %925 = vmatpush3.bf16.msra.mxu0 %v968_v13 }
 0x20b   :  { %v864_v30 = vpop.f32.mrb[4].mxu0 }
 0x20c   :  { %v316_v31 = vmul.f32 0.2, %v864_v30  ;;  %v299_v32 = vpop.f32.mrb[5].mxu0 }
 0x20d   :  { %v314_v33 = vmul.f32 0.2, %v299_v32  ;;  %v865_v34 = vpop.f32.mrb[6].mxu0 }
 0x20e   :  { %v317_v35 = vmul.f32 0.2, %v865_v34  ;;  %v302_v36 = vpop.f32.mrb[7].mxu0  ;;  %v320_v38 = vmax.f32 %v864_v30, %v316_v31 }
 0x20f   :  { %v315_v37 = vmul.f32 0.2, %v302_v36  ;;  %v318_v40 = vmax.f32 %v299_v32, %v314_v33 }
 0x210   :  { %v321_v39 = vmax.f32 %v865_v34, %v317_v35 }
 0x211   :  { %v319_v41 = vmax.f32 %v302_v36, %v315_v37 }
 0x212   :  { %v323_v42 = vpack.c.bf16 %v321_v39, %v320_v38 }
 0x213   :  { %v322_v43 = vpack.c.bf16 %v319_v41, %v318_v40 }
 0x215   :  { %882 = vmatprep.mubr.bf16.mxu1 %v322_v43 }
 0x216   :  { %883 = vmatmul.mubr.bf16.vlgmr.msra.gmra.mrb[4].mxu1 %v323_v42 }
 0x217   :  { %888 = vmatprep.mubr.msk.bf16.mxu1 %vm1117_vm0, %v1116_v0 }
 0x2e9   :  { %v884_v44 = vpop.f32.mrb[4].mxu1 }
 0x2ea   :  { %v422_v45 = vpop.f32.mrb[5].mxu1 }
 0x2eb   :  { %v885_v46 = vpop.f32.mrb[6].mxu1 }
 0x2ec   :  { %v438_v47 = vpack.c.bf16 %v885_v46, %v884_v44  ;;  %v425_v48 = vpop.f32.mrb[7].mxu1 }
 0x2ed   :  { %v437_v49 = vpack.c.bf16 %v425_v48, %v422_v45 }
 0x2ef   :  { %887 = vmatpush3.bf16.msra.mxu1 %v437_v49 }
 0x2f0   :  { %892 = vmatprep.subr.bf16.mxu1 %v1116_v0 }
 0x2f2   :  { %889 = vmatmul.mubr.msk.bf16.vlgmr.msra.gmra.mrb[8].mxu1 %vm107_vm1, %v1246_v3 }
 0x2f3   :  { %893 = vmatpush3.bf16.msra.mxu1 %v438_v47  ;;  %894 = vmatprep.mubr.msk.bf16.mxu1 %vm1117_vm0, %v1116_v0 }
 0x2f4   :  { %898 = vmatprep.subr.bf16.mxu1 %v1116_v0 }
 0x2fa   :  { %895 = vmatmul.mubr.msk.bf16.vlgmr.msra.gmra.mrb[12].mxu1 %vm107_vm1, %v1246_v3 }
 0x2fb   :  { %900 = vmatprep.mubr.msk.bf16.mxu1 %vm1117_vm0, %v1116_v0 }
 0x3c5   :  { %v473_v56 = vpop.f32.mrb[8].mxu1 }
 0x3c6   :  { %v521_v57 = vmul.f32 0.2, %v473_v56  ;;  %v890_v58 = vpop.f32.mrb[9].mxu1 }
 0x3c7   :  { %v476_v59 = vpop.f32.mrb[10].mxu1 }
 0x3c8   :  { %v522_v60 = vmul.f32 0.2, %v476_v59  ;;  %v891_v61 = vpop.f32.mrb[11].mxu1  ;;  %v525_v62 = vmax.f32 %v473_v56, %v521_v57 }
 0x3ca   :  { %v526_v63 = vmax.f32 %v476_v59, %v522_v60 }
 0x3cc   :  { %v529_v1 = vpack.c.bf16 %v526_v63, %v525_v62 }
 0x3cd   :  { %v514_v2 = vpop.f32.mrb[12].mxu1 }
 0x3ce   :  { %v523_v4 = vmul.f32 0.2, %v514_v2  ;;  %v896_v5 = vpop.f32.mrb[13].mxu1  ;;  %899 = vmatpush3.bf16.msra.mxu1 %v529_v1 }
 0x3cf   :  { %v517_v6 = vpop.f32.mrb[14].mxu1  ;;  %904 = vmatprep.subr.bf16.mxu1 %v1116_v0 }
 0x3d0   :  { %v524_v7 = vmul.f32 0.2, %v517_v6  ;;  %v897_v8 = vpop.f32.mrb[15].mxu1  ;;  %v527_v9 = vmax.f32 %v514_v2, %v523_v4 }
 0x3d1   :  { %901 = vmatmul.mubr.msk.bf16.vlgmr.msra.gmra.mrb[16].mxu1 %vm107_vm1, %v1246_v3 }
 0x3d2   :  { %v528_v10 = vmax.f32 %v517_v6, %v524_v7  ;;  %906 = vmatprep.mubr.msk.bf16.mxu1 %vm1117_vm0, %v1116_v0 }
 0x3d4   :  { %v530_v11 = vpack.c.bf16 %v528_v10, %v527_v9 }
 0x3d6   :  { %905 = vmatpush3.bf16.msra.mxu1 %v530_v11 }
 0x3d9   :  { %907 = vmatmul.mubr.msk.bf16.vlgmr.msra.gmra.mrb[20].mxu1 %vm107_vm1, %v1246_v3 }
 0x4a4   :  { %v565_v14 = vpop.f32.mrb[16].mxu1 }
 0x4a5   :  { %v902_v15 = vpop.f32.mrb[17].mxu1 }
 0x4a6   :  { %v568_v16 = vpop.f32.mrb[18].mxu1 }
 0x4a7   :  { %v613_v17 = vpack.c.bf16 %v568_v16, %v565_v14  ;;  %v903_v18 = vpop.f32.mrb[19].mxu1 }
 0x4a9   :  { %926 = vmatprep.mubr.bf16.mxu0 %v613_v17 }
 0x4ac   :  { %v606_v19 = vpop.f32.mrb[20].mxu1 }
 0x4ad   :  { %v908_v20 = vpop.f32.mrb[21].mxu1 }
 0x4ae   :  { %v609_v0 = vpop.f32.mrb[22].mxu1 }
 0x4af   :  { %v614_v21 = vpack.c.bf16 %v609_v0, %v606_v19  ;;  %v909_v22 = vpop.f32.mrb[23].mxu1 }
 0x4b1   :  { %927 = vmatmul.mubr.bf16.vlgmr.msra.gmra.mrb[8].mxu0 %v614_v21 }
 0x584   :  { %v928_v23 = vpop.f32.mrb[8].mxu0 }
 0x585   :  { %v730_v3 = vmul.f32 0.2, %v928_v23  ;;  %v713_v24 = vpop.f32.mrb[9].mxu0 }
 0x586   :  { %v728_v25 = vmul.f32 0.2, %v713_v24  ;;  %v929_v26 = vpop.f32.mrb[10].mxu0 }
 0x587   :  { %v734_v27 = vmax.f32 %v928_v23, %v730_v3  ;;  %v731_v28 = vmul.f32 0.2, %v929_v26  ;;  %v716_v29 = vpop.f32.mrb[11].mxu0 }
 0x588   :  { %v732_v30 = vmax.f32 %v713_v24, %v728_v25  ;;  %v729_v31 = vmul.f32 0.2, %v716_v29 }
 0x589   :  { %738 = vst [vmem:[#allocation11 + $0x10] sm:$0xff] %v734_v27  ;;  %v735_v32 = vmax.f32 %v929_v26, %v731_v28 }
 0x58a   :  { %736 = vst [vmem:[#allocation11] sm:$0xff] %v732_v30  ;;  %v733_v33 = vmax.f32 %v716_v29, %v729_v31 }
 0x58b   :  { %739 = vst [vmem:[#allocation11 + $0x18] sm:$0xff] %v735_v32 }
 0x58c   :  { %737 = vst [vmem:[#allocation11 + $0x8] sm:$0xff] %v733_v33 }
 0x58d   :  { %1090 = shalt.err (!%p1087_p2)
}
 0x58e   :  { %s1091_s3 = scalar_lea.hbm %s1289_s5, 512 }
 0x58f   :  { %p1092_p3 = scmp.ne.s32.totalorder %s1289_s5, %s1091_s3  ;;  %p1095_p4 = scmp.lt.u32.totalorder %s1091_s3, %s1289_s5 }
 0x591   :  { %p1097_p5 = pnand %p1095_p4, %p1092_p3 }
 0x593   :  { %1100 = shalt.err (!%p1097_p5)
}
 0x594   :  { %s1119_s10 = smov 128   ;;  %s1120_s11 = smov 8  }
 0x595   :  { %751 = dma.vmem_to_hbm [thread:$0]  %s746_s30, 512, %s1289_s5, [#allocation4], %s1119_s10, %s1119_s10, %s1120_s11  }
 0x596   :  { %1107 = dma.done.wait [#allocation4], 512  }
 0x597   :  { %1108 = vsyncadd [#allocation4], 4294966784 }
 0x598   :  { %755 = vsyncpa [#allocation3], 1 }
 0x599   :  { %756 = vsyncpa [#allocation6], 1 }
 0x59a   :  { %757 = vsyncpa [#allocation9], 1 }
 0x59b   :  { %758 = vsyncpa [#allocation4], 1 }

</bundles_post_ra>
